<compile_context>
chip_gen: v7x
topology: tpu7x:2x2x1
jax: 0.10.0
libtpu: 0.0.40
codegen_flags: <defaults>
</compile_context>

<pallas_src>
import jax
import jax.numpy as jnp
from jax import lax
from jax.experimental import pallas as pl
from jax.experimental.pallas import tpu as pltpu


# ---------------------------------------------------------------------------
# Fused pool -> embed -> head kernel
# ---------------------------------------------------------------------------
def _fused_kernel(x_ref, wf_ref, be_ref, wh_ref,        # inputs
                  emb_ref, stats_ref,                    # outputs
                  m_ref, l_ref, acc_ref):                # scratch
    t = pl.program_id(2)

    # ---- init online-softmax accumulators at the first token tile ----------
    @pl.when(t == 0)
    def _():
        m_ref[...] = jnp.full((1, 1), -jnp.inf, jnp.float32)
        l_ref[...] = jnp.zeros((1, 1), jnp.float32)
        acc_ref[...] = jnp.zeros((1, 1), jnp.float32)

    # ---- fused average-pool + linear projection (stand-in trunk) -----------
    # x block: (1, tile_T, pool*C) bf16.  The pooling mean is folded into the
    # (pool*C, D) weight, so pool+project is a single MXU matmul (f32 accum).
    xt = x_ref[0]                                              # (tile_T, pool*C)
    emb = jnp.dot(xt, wf_ref[...], preferred_element_type=jnp.float32)
    emb = emb + be_ref[...]                                    # (tile_T, D) f32

    emb_ref[0] = emb.astype(emb_ref.dtype)                     # embeddings returned

    # ---- head: AttentionPool2 + prediction_head, algebraically recast ------
    # Since the prediction head is linear:
    #   y = softmax(emb @ w_attn) . (emb @ w_pred) + b_pred
    # (the attention bias is a softmax-invariant shift and is dropped).
    # w_head is lane-padded to (D, 128): col 0 = scores, col 1 = per-token preds.
    st = jnp.dot(emb, wh_ref[...], preferred_element_type=jnp.float32)  # (tile_T,128)
    s = st[:, 0:1]                                             # attention scores
    v = st[:, 1:2]                                             # per-token preds

    m_prev = m_ref[...]                                        # (1, 1)
    m_new = jnp.maximum(m_prev, jnp.max(s, axis=0, keepdims=True))
    alpha = jnp.exp(m_prev - m_new)
    p = jnp.exp(s - m_new)                                     # (tile_T, 1)
    l_ref[...] = alpha * l_ref[...] + jnp.sum(p, axis=0, keepdims=True)
    acc_ref[...] = alpha * acc_ref[...] + jnp.sum(p * v, axis=0, keepdims=True)
    m_ref[...] = m_new

    # ---- emit this chunk's (m, l, acc) stats on its last token tile --------
    # stats_ref's index_map is constant over t, so this final write is what
    # gets written back to HBM (standard accumulator-output pattern).
    @pl.when(t == pl.num_programs(2) - 1)
    def _():
        lane = lax.broadcasted_iota(jnp.int32, (1, 128), 1)
        row = jnp.where(lane == 0, jnp.broadcast_to(m_ref[...], (1, 128)),
              jnp.where(lane == 1, jnp.broadcast_to(l_ref[...], (1, 128)),
              jnp.where(lane == 2, jnp.broadcast_to(acc_ref[...], (1, 128)),
                        0.0)))
        stats_ref[0, 0] = row


# ---------------------------------------------------------------------------
# Tiling helpers (VMEM-budget aware)
# ---------------------------------------------------------------------------
def _vmem_capacity_bytes():
    try:
        return int(pltpu.get_tpu_info().vmem_capacity_bytes)
    except Exception:
        return 64 * 1024 * 1024   # conservative fallback (v7x per-core VMEM)


def _pick_token_tile(T, per_token_bytes, budget_bytes, max_tile=2048):
    """Largest divisor of T that is sublane-aligned, <= max_tile, and whose
    double-buffered blocks fit the VMEM byte budget."""
    legal = [d for d in range(1, T + 1) if T % d == 0 and (d % 8 == 0 or d == T)]
    fits = [d for d in legal if d <= max_tile and d * per_token_bytes <= budget_bytes]
    if fits:
        return max(fits)
    return min(legal)


# ---------------------------------------------------------------------------
# Fused forward wrapper
# ---------------------------------------------------------------------------
def _fused_forward(params, x, target_length, *, emb_dtype=jnp.float32,
                   compute_dtype=jnp.bfloat16, max_token_tile=2048):
    """Fused pool->embed->head for a batch of one-hot DNA (B, L, C)."""
    B, L, C = x.shape
    T = int(target_length)
    assert L % T == 0, "input length must be a multiple of target_length"
    pool = L // T

    w_embed = params["w_embed"]                                 # (C, D)
    D = w_embed.shape[1]
    assert D % 128 == 0, "hidden dim must be a multiple of 128 (lane-dense)"

    # Fold the pooling mean into the projection: W_fold[p*C + c] = w_embed[c]/pool.
    w_fold = jnp.tile(w_embed.astype(jnp.float32) / pool,
                      (pool, 1)).astype(compute_dtype)          # (pool*C, D)
    b_embed = params["b_embed"].astype(jnp.float32).reshape(1, D)

    # Head weights lane-padded to (D, 128): col 0 = attention, col 1 = prediction.
    wh = jnp.zeros((D, 128), jnp.float32)
    wh = wh.at[:, 0].set(params["w_attn"].astype(jnp.float32).reshape(D))
    wh = wh.at[:, 1].set(params["w_pred"].astype(jnp.float32).reshape(D))
    # (b_attn is a softmax-invariant constant shift and is dropped.)

    # (B, L, C) -> (B, T, pool*C): contiguous (free) reshape so each token's
    # pooling window lands on the lane axis of its block.  One-hot is exact in
    # bf16, so no precision is lost on the x stream; avoid a cast pass by
    # generating the one-hot in bf16 upstream.
    x2 = x.reshape(B, T, pool * C)
    if x2.dtype != compute_dtype:
        x2 = x2.astype(compute_dtype)

    x_bytes = jnp.dtype(compute_dtype).itemsize
    emb_bytes = jnp.dtype(emb_dtype).itemsize

    cap = _vmem_capacity_bytes()
    resident = (w_fold.size * x_bytes + b_embed.size * 4 + wh.size * 4)
    per_token = 2 * pool * C * x_bytes + 2 * D * emb_bytes      # double-buffered
    tile_budget = max(cap // 2 - resident, 1)
    tile_T = _pick_token_tile(T, per_token, tile_budget, max_tile=max_token_tile)
    n_t = T // tile_T
    # Split the sequential token reduction into 2 independent chunks when
    # possible so it can shard across the two v7x TensorCores even at B=1.
    n_chunks = 2 if (n_t % 2 == 0 and n_t >= 2) else 1
    n_t_pc = n_t // n_chunks

    vmem_limit = min(int(cap * 3 // 4), 128 * 1024 * 1024)

    emb, stats = pl.pallas_call(
        _fused_kernel,
        out_shape=(
            jax.ShapeDtypeStruct((B, T, D), emb_dtype),          # embeddings
            jax.ShapeDtypeStruct((B, n_chunks, 1, 128), jnp.float32),  # softmax stats
        ),
        grid=(B, n_chunks, n_t_pc),
        in_specs=[
            pl.BlockSpec((1, tile_T, pool * C),
                         lambda b, c, t: (b, c * n_t_pc + t, 0)),
            pl.BlockSpec((pool * C, D), lambda b, c, t: (0, 0)),   # resident weights
            pl.BlockSpec((1, D), lambda b, c, t: (0, 0)),
            pl.BlockSpec((D, 128), lambda b, c, t: (0, 0)),
        ],
        out_specs=(
            pl.BlockSpec((1, tile_T, D), lambda b, c, t: (b, c * n_t_pc + t, 0)),
            pl.BlockSpec((1, 1, 1, 128), lambda b, c, t: (b, c, 0, 0)),
        ),
        scratch_shapes=[
            pltpu.VMEM((1, 1), jnp.float32),   # running max   m
            pltpu.VMEM((1, 1), jnp.float32),   # running denom l
            pltpu.VMEM((1, 1), jnp.float32),   # running numer acc
        ],
        compiler_params=pltpu.CompilerParams(
            dimension_semantics=("parallel", "parallel", "arbitrary"),
            vmem_limit_bytes=vmem_limit,
        ),
    )(x2, w_fold, b_embed, wh)

    # Merge per-chunk online-softmax stats (tiny XLA epilogue on (B, n_chunks)).
    m = stats[:, :, 0, 0]
    l = stats[:, :, 0, 1]
    a = stats[:, :, 0, 2]
    M = jnp.max(m, axis=1, keepdims=True)
    scale = jnp.exp(m - M)
    denom = jnp.sum(l * scale, axis=1)
    numer = jnp.sum(a * scale, axis=1)
    Y = (numer / denom)[:, None] + params["b_pred"].astype(jnp.float32)[0, 0]
    return Y, emb


# ---------------------------------------------------------------------------
# Model wrapper (matches FTEnformer.forward semantics)
# ---------------------------------------------------------------------------
def init_params(key, dim=64, in_channels=4):
    """Deterministic parameter init (shapes follow FTEnformer.__init__)."""
    D = 2 * dim  # enformer_hidden_dim = base.dim * 2
    k = jax.random.split(key, 6)
    return {
        # stand-in Enformer trunk projection
        "w_embed": jax.random.normal(k[0], (in_channels, D), jnp.float32) * 0.1,
        "b_embed": jax.random.normal(k[1], (1, D), jnp.float32) * 0.1,
        # AttentionPool2: nn.Linear(D, 1)   (bias is softmax-invariant)
        "w_attn": jax.random.normal(k[2], (1, D), jnp.float32) * 0.1,
        "b_attn": jax.random.normal(k[3], (1, 1), jnp.float32) * 0.1,
        # prediction_head: nn.Linear(D, 1)
        "w_pred": jax.random.normal(k[4], (1, D), jnp.float32) * 0.1,
        "b_pred": jax.random.normal(k[5], (1, 1), jnp.float32) * 0.1,
    }


def ft_enformer_forward(params, ref_X, indiv_X=None, both_allele=False,
                        target_length=8, **kw):
    # TODO(synk): the pretrained Enformer trunk (conv stem + transformer tower,
    # EleutherAI/enformer-official-rough) cannot be reproduced without its
    # checkpoint; a deterministic average-pool + linear projection stands in.
    if indiv_X is None:
        Y, ref_emb = _fused_forward(params, ref_X, target_length, **kw)
        return Y, ref_emb

    # Batch both alleles through ONE kernel launch (halves dispatch/pipeline
    # prologue cost and improves megacore occupancy at small B).
    B = ref_X.shape[0]
    x_all = jnp.concatenate([ref_X, indiv_X], axis=0)
    Y_all, emb_all = _fused_forward(params, x_all, target_length, **kw)
    Y, indiv_Y = Y_all[:B], Y_all[B:]
    ref_emb, indiv_emb = emb_all[:B], emb_all[B:]

    if both_allele:
        # torch.stack([Y, indiv_Y], dim=2).mean(dim=2) == elementwise average
        return (Y + indiv_Y) * 0.5, ref_emb, indiv_emb
    return Y, ref_emb, indiv_Y, indiv_emb


# ---------------------------------------------------------------------------
# Pure-JAX reference (elementwise, full f32) for correctness checks
# ---------------------------------------------------------------------------
def _ref_forward(params, x, target_length):
    B, L, C = x.shape
    T = target_length
    pool = L // T
    xf = x.astype(jnp.float32)
    xp = xf.reshape(B, T, pool, C).mean(axis=2)                          # (B,T,C)
    emb = jnp.sum(xp[..., None] * params["w_embed"][None, None], axis=2) \
        + params["b_embed"]                                              # (B,T,D)
    scores = jnp.sum(emb * params["w_attn"][0], axis=-1) + params["b_attn"][0, 0]
    attn = jax.nn.softmax(scores, axis=-1)                               # (B,T)
    pooled = jnp.sum(attn[..., None] * emb, axis=1)                      # (B,D)
    y = jnp.sum(pooled * params["w_pred"][0], axis=-1, keepdims=True) \
        + params["b_pred"][0, 0]
    return y, emb


if __name__ == "__main__":
    key = jax.random.PRNGKey(0)
    B, L, C = 2, 64, 4          # batch, input sequence length, one-hot DNA
    dim, T = 64, 8              # stand-in base.dim -> hidden D = 128, target_length
    k_p, k_r, k_i, k_m = jax.random.split(key, 4)

    params = init_params(k_p, dim=dim, in_channels=C)

    ref_idx = jax.random.randint(k_r, (B, L), 0, C)
    indiv_idx = jax.random.randint(k_i, (B, L), 0, C)
    ref_X = jax.nn.one_hot(ref_idx, C, dtype=jnp.bfloat16)      # exact in bf16
    indiv_X = jax.nn.one_hot(indiv_idx, C, dtype=jnp.bfloat16)

    # Path 1: indiv_X is None
    Y, ref_emb = ft_enformer_forward(params, ref_X, target_length=T)
    Y = jax.block_until_ready(Y)
    ref_emb = jax.block_until_ready(ref_emb)
    assert Y.shape == (B, 1) and ref_emb.shape == (B, T, 2 * dim)

    y_exp, emb_exp = _ref_forward(params, ref_X, T)
    assert jnp.allclose(ref_emb, emb_exp, atol=1e-2, rtol=1e-2)
    assert jnp.allclose(Y, y_exp, atol=2e-2, rtol=2e-2), (Y, y_exp)

    # Path 2: both alleles, both_allele=True (single batched kernel launch)
    avg_Y, ref_emb2, indiv_emb = ft_enformer_forward(
        params, ref_X, indiv_X=indiv_X, both_allele=True, target_length=T)
    avg_Y = jax.block_until_ready(avg_Y)
    assert avg_Y.shape == (B, 1) and indiv_emb.shape == (B, T, 2 * dim)

    y_ind_exp, emb_ind_exp = _ref_forward(params, indiv_X, T)
    assert jnp.allclose(indiv_emb, emb_ind_exp, atol=1e-2, rtol=1e-2)
    assert jnp.allclose(avg_Y, (y_exp + y_ind_exp) * 0.5, atol=2e-2, rtol=2e-2)

    # Path 3: both alleles, both_allele=False
    Y3, e3, iY3, ie3 = ft_enformer_forward(
        params, ref_X, indiv_X=indiv_X, both_allele=False, target_length=T)
    jax.block_until_ready(iY3)
    assert Y3.shape == (B, 1) and iY3.shape == (B, 1)
    assert jnp.allclose(iY3, y_ind_exp, atol=2e-2, rtol=2e-2)

    # Path 4: multi-tile / multi-chunk reduction path at B=1 with bf16
    # embeddings (exercises the online softmax across token tiles and the
    # cross-chunk stats merge that feeds both v7x TensorCores at batch 1).
    L2, T2 = 512, 64
    long_idx = jax.random.randint(k_m, (1, L2), 0, C)
    long_X = jax.nn.one_hot(long_idx, C, dtype=jnp.bfloat16)
    Y4, emb4 = ft_enformer_forward(params, long_X, target_length=T2,
                                   emb_dtype=jnp.bfloat16, max_token_tile=16)
    Y4 = jax.block_until_ready(Y4)
    y4_exp, emb4_exp = _ref_forward(params, long_X, T2)
    assert emb4.dtype == jnp.bfloat16 and emb4.shape == (1, T2, 2 * dim)
    assert jnp.allclose(emb4.astype(jnp.float32), emb4_exp, atol=2e-2, rtol=2e-2)
    assert jnp.allclose(Y4, y4_exp, atol=2e-2, rtol=2e-2)

    print("KERNEL_OK")
</pallas_src>

<mosaic_0001>
module attributes {stable_mosaic.version = 11 : i64} {
  func.func @_fused_kernel(%arg0: i32, %arg1: i32, %arg2: i32, %arg3: memref<1x8x32xbf16, #tpu.memory_space<vmem>>, %arg4: memref<32x128xbf16, #tpu.memory_space<vmem>>, %arg5: memref<1x128xf32, #tpu.memory_space<vmem>>, %arg6: memref<128x128xf32, #tpu.memory_space<vmem>>, %arg7: memref<1x8x128xf32, #tpu.memory_space<vmem>>, %arg8: memref<1x1x1x128xf32, #tpu.memory_space<vmem>>, %arg9: memref<1x1xf32, #tpu.memory_space<vmem>>, %arg10: memref<1x1xf32, #tpu.memory_space<vmem>>, %arg11: memref<1x1xf32, #tpu.memory_space<vmem>>) attributes {dimension_semantics = [#tpu.dimension_semantics<parallel>, #tpu.dimension_semantics<parallel>, #tpu.dimension_semantics<arbitrary>], iteration_bounds = array<i64: 2, 1, 1>, scalar_prefetch = 0 : i64, scratch_operands = 3 : i64, tpu.core_type = #tpu.core_type<tc>, window_params = [{transform_indices = @transform_0, window_bounds = array<i64: 1, 8, 32>}, {pipeline_mode = #tpu.pipeline_mode<synchronous>, transform_indices = @transform_1, window_bounds = array<i64: 32, 128>}, {pipeline_mode = #tpu.pipeline_mode<synchronous>, transform_indices = @transform_2, window_bounds = array<i64: 1, 128>}, {pipeline_mode = #tpu.pipeline_mode<synchronous>, transform_indices = @transform_3, window_bounds = array<i64: 128, 128>}, {transform_indices = @transform_4, window_bounds = array<i64: 1, 8, 128>}, {transform_indices = @transform_5, window_bounds = array<i64: 1, 1, 1, 128>}]} {
    %c0_i32 = arith.constant 0 : i32
    %0 = arith.cmpi eq, %arg2, %c0_i32 : i32
    %1 = arith.extui %0 : i1 to i32
    %c0_i32_0 = arith.constant 0 : i32
    %2 = arith.cmpi ne, %1, %c0_i32_0 : i32
    scf.if %2 {
      %cst_30 = arith.constant 0xFF800000 : f32
      %43 = vector.broadcast %cst_30 : f32 to vector<1x1xf32>
      %c0_31 = arith.constant 0 : index
      %c0_32 = arith.constant 0 : index
      %44 = vector.load %arg9[%c0_31, %c0_32] : memref<1x1xf32, #tpu.memory_space<vmem>>, vector<1x1xf32>
      tpu.vector_store %arg9[%c0_31, %c0_32], %43 {strides = array<i32>} : memref<1x1xf32, #tpu.memory_space<vmem>>, vector<1x1xf32>,
      %cst_33 = arith.constant 0.000000e+00 : f32
      %45 = vector.broadcast %cst_33 : f32 to vector<1x1xf32>
      %c0_34 = arith.constant 0 : index
      %c0_35 = arith.constant 0 : index
      %46 = vector.load %arg10[%c0_34, %c0_35] : memref<1x1xf32, #tpu.memory_space<vmem>>, vector<1x1xf32>
      tpu.vector_store %arg10[%c0_34, %c0_35], %45 {strides = array<i32>} : memref<1x1xf32, #tpu.memory_space<vmem>>, vector<1x1xf32>,
      %cst_36 = arith.constant 0.000000e+00 : f32
      %47 = vector.broadcast %cst_36 : f32 to vector<1x1xf32>
      %c0_37 = arith.constant 0 : index
      %c0_38 = arith.constant 0 : index
      %48 = vector.load %arg11[%c0_37, %c0_38] : memref<1x1xf32, #tpu.memory_space<vmem>>, vector<1x1xf32>
      tpu.vector_store %arg11[%c0_37, %c0_38], %47 {strides = array<i32>} : memref<1x1xf32, #tpu.memory_space<vmem>>, vector<1x1xf32>,
    } else {
    }
    %c0 = arith.constant 0 : index
    %c0_1 = arith.constant 0 : index
    %c0_2 = arith.constant 0 : index
    %3 = vector.load %arg3[%c0, %c0_1, %c0_2] : memref<1x8x32xbf16, #tpu.memory_space<vmem>>, vector<1x8x32xbf16>
    %4 = vector.shape_cast %3 : vector<1x8x32xbf16> to vector<8x32xbf16>
    %c0_3 = arith.constant 0 : index
    %c0_4 = arith.constant 0 : index
    %5 = vector.load %arg4[%c0_3, %c0_4] : memref<32x128xbf16, #tpu.memory_space<vmem>>, vector<32x128xbf16>
    %cst = arith.constant dense<0.000000e+00> : vector<8x128xf32>
    %6 = tpu.matmul %4, %5, %cst {dimension_numbers = #tpu.dot_dimension_numbers<[1], [0], [0], [1], [0, 0, 1, 1], [], []>} : vector<8x32xbf16>, vector<32x128xbf16>, vector<8x128xf32> -> vector<8x128xf32>
    %c0_5 = arith.constant 0 : index
    %c0_6 = arith.constant 0 : index
    %7 = vector.load %arg5[%c0_5, %c0_6] : memref<1x128xf32, #tpu.memory_space<vmem>>, vector<1x128xf32>
    %8 = vector.broadcast %7 : vector<1x128xf32> to vector<8x128xf32>
    %9 = arith.addf %6, %8 : vector<8x128xf32>
    %c0_7 = arith.constant 0 : index
    %c0_8 = arith.constant 0 : index
    %c0_9 = arith.constant 0 : index
    %10 = vector.load %arg7[%c0_7, %c0_8, %c0_9] : memref<1x8x128xf32, #tpu.memory_space<vmem>>, vector<1x8x128xf32>
    %11 = vector.shape_cast %10 : vector<1x8x128xf32> to vector<8x128xf32>
    %12 = vector.shape_cast %9 : vector<8x128xf32> to vector<1x8x128xf32>
    tpu.vector_store %arg7[%c0_7, %c0_8, %c0_9], %12 {strides = array<i32>} : memref<1x8x128xf32, #tpu.memory_space<vmem>>, vector<1x8x128xf32>,
    %c0_10 = arith.constant 0 : index
    %c0_11 = arith.constant 0 : index
    %13 = vector.load %arg6[%c0_10, %c0_11] : memref<128x128xf32, #tpu.memory_space<vmem>>, vector<128x128xf32>
    %cst_12 = arith.constant dense<0.000000e+00> : vector<8x128xf32>
    %14 = tpu.matmul %9, %13, %cst_12 {dimension_numbers = #tpu.dot_dimension_numbers<[1], [0], [0], [1], [0, 0, 1, 1], [], []>} : vector<8x128xf32>, vector<128x128xf32>, vector<8x128xf32> -> vector<8x128xf32>
    %15 = vector.extract_strided_slice %14 {offsets = [0, 0], sizes = [8, 1], strides = [1, 1]} : vector<8x128xf32> to vector<8x1xf32>
    %16 = vector.extract_strided_slice %14 {offsets = [0, 1], sizes = [8, 1], strides = [1, 1]} : vector<8x128xf32> to vector<8x1xf32>
    %c0_13 = arith.constant 0 : index
    %c0_14 = arith.constant 0 : index
    %17 = vector.load %arg9[%c0_13, %c0_14] : memref<1x1xf32, #tpu.memory_space<vmem>>, vector<1x1xf32>
    %cst_15 = arith.constant dense<0xFF800000> : vector<1xf32>
    %18 = vector.multi_reduction <maximumf>, %15, %cst_15 [0] : vector<8x1xf32> to vector<1xf32>
    %19 = vector.shape_cast %18 : vector<1xf32> to vector<1x1xf32>
    %20 = arith.maximumf %17, %19 : vector<1x1xf32>
    %21 = arith.subf %17, %20 : vector<1x1xf32>
    %22 = math.exp %21 : vector<1x1xf32>
    %23 = vector.broadcast %20 : vector<1x1xf32> to vector<8x1xf32>
    %24 = arith.subf %15, %23 : vector<8x1xf32>
    %25 = math.exp %24 : vector<8x1xf32>
    %c0_16 = arith.constant 0 : index
    %c0_17 = arith.constant 0 : index
    %26 = vector.load %arg10[%c0_16, %c0_17] : memref<1x1xf32, #tpu.memory_space<vmem>>, vector<1x1xf32>
    %27 = arith.mulf %22, %26 : vector<1x1xf32>
    %cst_18 = arith.constant dense<0.000000e+00> : vector<1xf32>
    %28 = vector.multi_reduction <add>, %25, %cst_18 [0] : vector<8x1xf32> to vector<1xf32>
    %29 = vector.shape_cast %28 : vector<1xf32> to vector<1x1xf32>
    %30 = arith.addf %27, %29 : vector<1x1xf32>
    %c0_19 = arith.constant 0 : index
    %c0_20 = arith.constant 0 : index
    %31 = vector.load %arg10[%c0_19, %c0_20] : memref<1x1xf32, #tpu.memory_space<vmem>>, vector<1x1xf32>
    tpu.vector_store %arg10[%c0_19, %c0_20], %30 {strides = array<i32>} : memref<1x1xf32, #tpu.memory_space<vmem>>, vector<1x1xf32>,
    %c0_21 = arith.constant 0 : index
    %c0_22 = arith.constant 0 : index
    %32 = vector.load %arg11[%c0_21, %c0_22] : memref<1x1xf32, #tpu.memory_space<vmem>>, vector<1x1xf32>
    %33 = arith.mulf %22, %32 : vector<1x1xf32>
    %34 = arith.mulf %25, %16 : vector<8x1xf32>
    %cst_23 = arith.constant dense<0.000000e+00> : vector<1xf32>
    %35 = vector.multi_reduction <add>, %34, %cst_23 [0] : vector<8x1xf32> to vector<1xf32>
    %36 = vector.shape_cast %35 : vector<1xf32> to vector<1x1xf32>
    %37 = arith.addf %33, %36 : vector<1x1xf32>
    %c0_24 = arith.constant 0 : index
    %c0_25 = arith.constant 0 : index
    %38 = vector.load %arg11[%c0_24, %c0_25] : memref<1x1xf32, #tpu.memory_space<vmem>>, vector<1x1xf32>
    tpu.vector_store %arg11[%c0_24, %c0_25], %37 {strides = array<i32>} : memref<1x1xf32, #tpu.memory_space<vmem>>, vector<1x1xf32>,
    %c0_26 = arith.constant 0 : index
    %c0_27 = arith.constant 0 : index
    %39 = vector.load %arg9[%c0_26, %c0_27] : memref<1x1xf32, #tpu.memory_space<vmem>>, vector<1x1xf32>
    tpu.vector_store %arg9[%c0_26, %c0_27], %20 {strides = array<i32>} : memref<1x1xf32, #tpu.memory_space<vmem>>, vector<1x1xf32>,
    %c0_i32_28 = arith.constant 0 : i32
    %40 = arith.cmpi eq, %arg2, %c0_i32_28 : i32
    %41 = arith.extui %40 : i1 to i32
    %c0_i32_29 = arith.constant 0 : i32
    %42 = arith.cmpi ne, %41, %c0_i32_29 : i32
    scf.if %42 {
      %43 = tpu.iota {dimensions = array<i32: 1>} : vector<1x128xi32>
      %c0_i32_30 = arith.constant 0 : i32
      %44 = vector.broadcast %c0_i32_30 : i32 to vector<1x128xi32>
      %45 = arith.cmpi eq, %43, %44 : vector<1x128xi32>
      %c0_31 = arith.constant 0 : index
      %c0_32 = arith.constant 0 : index
      %46 = vector.load %arg9[%c0_31, %c0_32] : memref<1x1xf32, #tpu.memory_space<vmem>>, vector<1x1xf32>
      %47 = vector.shape_cast %46 : vector<1x1xf32> to vector<1x1xf32>
      %48 = vector.broadcast %47 : vector<1x1xf32> to vector<1x128xf32>
      %c1_i32 = arith.constant 1 : i32
      %49 = vector.broadcast %c1_i32 : i32 to vector<1x128xi32>
      %50 = arith.cmpi eq, %43, %49 : vector<1x128xi32>
      %c0_33 = arith.constant 0 : index
      %c0_34 = arith.constant 0 : index
      %51 = vector.load %arg10[%c0_33, %c0_34] : memref<1x1xf32, #tpu.memory_space<vmem>>, vector<1x1xf32>
      %52 = vector.shape_cast %51 : vector<1x1xf32> to vector<1x1xf32>
      %53 = vector.broadcast %52 : vector<1x1xf32> to vector<1x128xf32>
      %c2_i32 = arith.constant 2 : i32
      %54 = vector.broadcast %c2_i32 : i32 to vector<1x128xi32>
      %55 = arith.cmpi eq, %43, %54 : vector<1x128xi32>
      %c0_35 = arith.constant 0 : index
      %c0_36 = arith.constant 0 : index
      %56 = vector.load %arg11[%c0_35, %c0_36] : memref<1x1xf32, #tpu.memory_space<vmem>>, vector<1x1xf32>
      %57 = vector.shape_cast %56 : vector<1x1xf32> to vector<1x1xf32>
      %58 = vector.broadcast %57 : vector<1x1xf32> to vector<1x128xf32>
      %cst_37 = arith.constant 0.000000e+00 : f32
      %59 = vector.broadcast %cst_37 : f32 to vector<1x128xf32>
      %60 = arith.select %55, %58, %59 : vector<1x128xi1>, vector<1x128xf32>
      %61 = arith.select %50, %53, %60 : vector<1x128xi1>, vector<1x128xf32>
      %62 = arith.select %45, %48, %61 : vector<1x128xi1>, vector<1x128xf32>
      %c0_38 = arith.constant 0 : index
      %c0_39 = arith.constant 0 : index
      %c0_40 = arith.constant 0 : index
      %c0_41 = arith.constant 0 : index
      %63 = vector.load %arg8[%c0_38, %c0_39, %c0_40, %c0_41] : memref<1x1x1x128xf32, #tpu.memory_space<vmem>>, vector<1x1x1x128xf32>
      %64 = vector.shape_cast %63 : vector<1x1x1x128xf32> to vector<1x128xf32>
      %65 = vector.shape_cast %62 : vector<1x128xf32> to vector<1x1x1x128xf32>
      tpu.vector_store %arg8[%c0_38, %c0_39, %c0_40, %c0_41], %65 {strides = array<i32>} : memref<1x1x1x128xf32, #tpu.memory_space<vmem>>, vector<1x1x1x128xf32>,
    } else {
    }
    return
  }
  func.func @transform_0(%arg0: i32, %arg1: i32, %arg2: i32) -> (i32, i32, i32) {
    %c1_i32 = arith.constant 1 : i32
    %0 = arith.muli %arg1, %c1_i32 : i32
    %1 = arith.addi %0, %arg2 : i32
    %c0_i32 = arith.constant 0 : i32
    %c0_i32_0 = arith.constant 0 : i32
    return %arg0, %1, %c0_i32 : i32, i32, i32
  }
  func.func @transform_1(%arg0: i32, %arg1: i32, %arg2: i32) -> (i32, i32) {
    %c0_i32 = arith.constant 0 : i32
    %c0_i32_0 = arith.constant 0 : i32
    %c0_i32_1 = arith.constant 0 : i32
    return %c0_i32, %c0_i32_0 : i32, i32
  }
  func.func @transform_2(%arg0: i32, %arg1: i32, %arg2: i32) -> (i32, i32) {
    %c0_i32 = arith.constant 0 : i32
    %c0_i32_0 = arith.constant 0 : i32
    %c0_i32_1 = arith.constant 0 : i32
    return %c0_i32, %c0_i32_0 : i32, i32
  }
  func.func @transform_3(%arg0: i32, %arg1: i32, %arg2: i32) -> (i32, i32) {
    %c0_i32 = arith.constant 0 : i32
    %c0_i32_0 = arith.constant 0 : i32
    %c0_i32_1 = arith.constant 0 : i32
    return %c0_i32, %c0_i32_0 : i32, i32
  }
  func.func @transform_4(%arg0: i32, %arg1: i32, %arg2: i32) -> (i32, i32, i32) {
    %c1_i32 = arith.constant 1 : i32
    %0 = arith.muli %arg1, %c1_i32 : i32
    %1 = arith.addi %0, %arg2 : i32
    %c0_i32 = arith.constant 0 : i32
    %c0_i32_0 = arith.constant 0 : i32
    return %arg0, %1, %c0_i32 : i32, i32, i32
  }
  func.func @transform_5(%arg0: i32, %arg1: i32, %arg2: i32) -> (i32, i32, i32, i32) {
    %c0_i32 = arith.constant 0 : i32
    %c0_i32_0 = arith.constant 0 : i32
    %c0_i32_1 = arith.constant 0 : i32
    return %arg0, %arg1, %c0_i32, %c0_i32_0 : i32, i32, i32, i32
  }
}

</mosaic_0001>

<bundles_post_ra>
// kernel: tpu_custom_call.1
= control target key start
LH: loop header
LB: loop body
LE: loop exit
PB: predicated region body
PF: predicated region fallthrough
CT: control target
= control target key end

     0   :  { %11 = vsyncpa [#allocation6], 0  ;;  %s1502_s0 = inlined_call_operand.hbm [shape: bf16[2,8,32], index: 0, kind: input, shape index: {}]   ;;  %s1503_s1 = inlined_call_operand.hbm [shape: bf16[32,128], index: 1, kind: input, shape index: {}]   ;;  %s1504_s2 = inlined_call_operand.vmem [shape: f32[1,128], index: 2, kind: input, shape index: {}]   ;;  %s1505_s3 = inlined_call_operand.hbm [shape: f32[128,128], index: 3, kind: input, shape index: {}]   ;;  %s1506_s4 = inlined_call_operand.hbm [shape: f32[2,8,128], index: 4, kind: output, shape index: {0}]   ;;  %s1507_s5 = inlined_call_operand.hbm [shape: f32[2,1,1,128], index: 5, kind: output, shape index: {1}]  }
   0x1   :  { %13 = vsyncpa [#allocation6 + $0x1], 0 }
   0x2   :  { %14 = vsyncpa [#allocation9], 0 }
   0x3   :  { %15 = vsyncpa [#allocation7], 0 }
   0x4   :  { %17 = vsyncpa [#allocation7 + $0x1], 0 }
   0x5   :  { %18 = vsyncpa [#allocation13], 0 }
   0x6   :  { %20 = vsyncpa [#allocation13 + $0x1], 0  ;;  %s1202_s18 = smov 0   ;;  %s1204_s19 = smov 0  }
   0x7   :  { %s1206_s20 = smov 0   ;;  %s1208_s21 = smov 0  }
   0x8   :  { %s1210_s22 = smov 0   ;;  %s1212_s23 = smov 0  }
   0x9 LB: > { %s736_s24 = sadd.s32 4294967295, %s1155_s23   ;;  %s737_s25 = sadd.s32 4294967294, %s1155_s23   ;;  %s1155_s23 = sphi %s1212_s23, %s26_s23   ;;  %s1151_s22 = sphi %s1210_s22, %s1529_s22   ;;  %s1147_s21 = sphi %s1208_s21, %s1528_s21   ;;  %s1143_s20 = sphi %s1206_s20, %s1527_s20   ;;  %s1139_s19 = sphi %s1204_s19, %s1526_s19   ;;  %s1135_s18 = sphi %s1202_s18, %s1525_s18  }
   0xa   : > { %p69_p0 = scmp.ne.s32.totalorder %s1139_s19, %s1135_s18  ;;  %p1236_p1 = scmp.eq.s32.totalorder %s736_s24, 0 }
   0xb   : > { %p1240_p2 = scmp.eq.s32.totalorder %s736_s24, 1  ;;  %p166_p3 = scmp.eq.s32.totalorder %s737_s25, 1 }
   0xc   : > { %s1512_s26 = scalar_select %p1236_p1, 1, 0 }
   0xd   : > { %p1246_p4 = por %p1236_p1, %p69_p0  ;;  %p738_p5 = scmp.ge.s32.totalorder %s1155_s23, 1 }
   0xe   : > { %p1251_p6 = por %p166_p3, %p69_p0  ;;  %p201_p7 = scmp.lt.s32.totalorder %s1155_s23, 3 }
   0xf   : > { %s1514_s28 = scalar_select %p1246_p4, 1, 0 }
  0x10   : > { %s1515_s29 = scalar_select %p1251_p6, 1, 0 }
  0x11   : > { %p1256_p8 = pnand %p738_p5, %p201_p7  ;;  %s1157_s6 = smov [#allocation8]  }
  0x12   : > { %s213_s7 = sshll.u32 %s1157_s6, 4  ;;  %s1158_s9 = smov [#allocation10]   ;;  %s1260_s7 = int_to_ptr.vmem [resolvable:$true] %s213_s7 }
  0x13   : > { %p859_p9 = pneg %p1256_p8  ;;  %s229_s10 = sshll.u32 %s1158_s9, 4  ;;  %s1271_s10 = int_to_ptr.vmem [resolvable:$true] %s229_s10 }
  0x14   : > { %s951_s13 = scalar_lea.hbm %s1503_s1, 256 }
  0x15   : > { %p1267_p11 = pnand %p859_p9, %p1236_p1  ;;  %p952_p12 = scmp.ne.s32.totalorder %s1503_s1, %s951_s13 }
  0x16   : > { %p958_p5 = scmp.lt.u32.totalorder %s951_s13, %s1503_s1 }
  0x17   : > { %p953_p13 = pneg %p1267_p11 }
  0x19   : > { %p954_p0 = pnand %p953_p13, %p952_p12 }
  0x1b   : > { %p955_p3 = pneg %p954_p0 }
  0x1d   : > { %p960_p7 = pnand %p958_p5, %p955_p3 }
  0x1f   : > { %963 = shalt.err (!%p960_p7)
}
  0x20   : > { %s964_s24 = scalar_lea.vmem %s1260_s7, 256  ;;  %p972_p1 = scmp.lt.s32.totalorder %s1260_s7, %s1260_s7 }
  0x21   : > { %p965_p9 = scmp.ne.s32.totalorder %s1260_s7, %s964_s24  ;;  %p973_p12 = scmp.lt.s32.totalorder %s964_s24, %s964_s24 }
  0x23   : > { %p967_p10 = pnand %p965_p9, %p953_p13  ;;  %p974_p0 = por %p973_p12, %p972_p1 }
  0x25   : > { %p968_p6 = pneg %p967_p10 }
  0x27   : > { %p975_p4 = pnand %p974_p0, %p968_p6 }
  0x29   : > { %978 = shalt.err (!%p975_p4)
}
  0x2a   : > { %s1159_s25 = smov 64   ;;  %s1160_s6 = smov 4  }
  0x2b   : > { %862 = dma.hbm_to_vmem [thread:$0]  (!%p1267_p11), %s1503_s1, 256, %s1260_s7, [#allocation9], %s1159_s25, %s1159_s25, %s1160_s6  }
  0x2c   : > { %s979_s14 = scalar_lea.hbm %s1505_s3, 2048 }
  0x2d   : > { %p980_p1 = scmp.ne.s32.totalorder %s1505_s3, %s979_s14  ;;  %p986_p10 = scmp.lt.u32.totalorder %s979_s14, %s1505_s3 }
  0x2f   : > { %p982_p4 = pnand %p980_p1, %p953_p13 }
  0x31   : > { %p983_p6 = pneg %p982_p4 }
  0x33   : > { %p988_p3 = pnand %p986_p10, %p983_p6 }
  0x35   : > { %991 = shalt.err (!%p988_p3)
}
  0x36   : > { %s992_s7 = scalar_lea.vmem %s1271_s10, 2048  ;;  %p1000_p12 = scmp.lt.s32.totalorder %s1271_s10, %s1271_s10 }
  0x37   : > { %p993_p5 = scmp.ne.s32.totalorder %s1271_s10, %s992_s7  ;;  %p1001_p0 = scmp.lt.s32.totalorder %s992_s7, %s992_s7 }
  0x39   : > { %p995_p7 = pnand %p993_p5, %p953_p13  ;;  %p1002_p1 = por %p1001_p0, %p1000_p12 }
  0x3b   : > { %p996_p9 = pneg %p995_p7 }
  0x3d   : > { %p1003_p4 = pnand %p1002_p1, %p996_p9 }
  0x3f   : > { %1006 = shalt.err (!%p1003_p4)
}
  0x40   : > { %s1161_s25 = smov 128   ;;  %s1162_s6 = smov 8  }
  0x41   : > { %865 = dma.hbm_to_vmem [thread:$0]  (!%p1267_p11), %s1505_s3, 2048, %s1271_s10, [#allocation9], %s1161_s25, %s1161_s25, %s1162_s6  }
  0x42   : > { %s45_s12 = sadd.s32 1, %s1151_s22  ;;  %s56_s13 = sadd.s32 1, %s1143_s20 }
  0x43   : > { %p47_p13 = scmp.ge.s32.totalorder %s45_s12, 2  ;;  %p63_p6 = scmp.ne.s32.totalorder %s1143_s20, %s1139_s19 }
  0x44   : > { %p64_p10 = scmp.eq.s32.totalorder %s1155_s23, 0  ;;  %p879_p3 = scmp.lt.s32.totalorder %s1155_s23, 2 }
  0x45   : > { %s1531_s12 = smov (%p47_p13, %s45_s12), 0  ;;  %p1335_p7 = por %p1240_p2, %p63_p6 }
  0x46   : > { %p65_p5 = por %p64_p10, %p63_p6  ;;  %s51_s8 = ssub.s32 %s1151_s22, %s1531_s12 }
  0x47   : > { %s1518_s14 = scalar_select %p1335_p7, 1, 0 }
  0x48   : > { %s243_s15 = sand.u32 1, %s1143_s20   ;;  %p54_p9 = scmp.eq.s32.totalorder %s51_s8, 0 }
  0x49   : > { %s742_s10 = sshll.u32 %s243_s15, 2  ;;  %s743_s16 = sshll.u32 %s1151_s22, 6 }
  0x4a   : > { %s1344_s17 = scalar_select %p54_p9, %s1143_s20, %s56_s13  }
  0x4b   : > { %s1349_s25 = scalar_lea.hbm %s1502_s0, %s743_s16  ;;  %s247_s27 = scalar_lea.vmem [#allocation5], %s742_s10 }
  0x4c   : > { %s256_s6 = sshll.u32 %s247_s27, 4  ;;  %p1353_p2 = pnand %p879_p3, %p65_p5  ;;  %s1357_s6 = int_to_ptr.vmem [resolvable:$true] %s256_s6 }
  0x4d   : > { %s244_s11 = scalar_lea.sflag [#allocation6], %s243_s15  ;;  %s1007_s13 = scalar_lea.hbm %s1349_s25, 64 }
  0x4e   : > { %p1008_p11 = scmp.ne.s32.totalorder %s1349_s25, %s1007_s13  ;;  %p1009_p12 = pneg %p1353_p2 }
  0x4f   : > { %s1012_s16 = scalar_lea.hbm %s1502_s0, 128  ;;  %p1013_p4 = scmp.lt.u32.totalorder %s1349_s25, %s1502_s0 }
  0x50   : > { %p1010_p0 = pnand %p1009_p12, %p1008_p11  ;;  %p1014_p13 = scmp.lt.u32.totalorder %s1012_s16, %s1007_s13 }
  0x51   : > { %p1016_p10 = scmp.lt.u32.totalorder %s1007_s13, %s1349_s25 }
  0x52   : > { %p1011_p1 = pneg %p1010_p0  ;;  %p1015_p6 = por %p1014_p13, %p1013_p4 }
  0x54   : > { %p1017_p3 = por %p1016_p10, %p1015_p6 }
  0x56   : > { %p1018_p5 = pnand %p1017_p3, %p1011_p1 }
  0x58   : > { %1021 = shalt.err (!%p1018_p5)
}
  0x59   : > { %s1022_s15 = scalar_lea.vmem %s1357_s6, 64  ;;  %s1163_s27 = smov [#allocation5]  }
  0x5a   : > { %p1023_p9 = scmp.ne.s32.totalorder %s1357_s6, %s1022_s15  ;;  %s1027_s8 = sshll.u32 %s1163_s27, 4  ;;  %s1028_s8 = int_to_ptr.vmem [resolvable:$false] %s1027_s8 }
  0x5b   : > { %s1029_s10 = scalar_lea.vmem %s1028_s8, 128  ;;  %p1030_p7 = scmp.lt.s32.totalorder %s1357_s6, %s1028_s8 }
  0x5c   : > { %p1025_p11 = pnand %p1023_p9, %p1009_p12  ;;  %p1031_p4 = scmp.lt.s32.totalorder %s1029_s10, %s1022_s15 }
  0x5e   : > { %p1026_p0 = pneg %p1025_p11  ;;  %p1032_p13 = por %p1031_p4, %p1030_p7 }
  0x60   : > { %p1033_p6 = pnand %p1032_p13, %p1026_p0 }
  0x62   : > { %1036 = shalt.err (!%p1033_p6)
}
  0x63   : > { %869 = dma.hbm_to_vmem [thread:$0]  (!%p1353_p2), %s1349_s25, 64, %s1357_s6, %s244_s11  }
  0x64   : > { %265 = sbr.rel (%p1256_p8) target bundleno = 834 (0x342), region = 36  ;;  %s1387_s13 = sand.u32 (!%p1256_p8), 1, %s1139_s19  }
  0x65   : > { %s745_s16 = sshll.u32 (!%p1256_p8), %s1387_s13, 2  ;;  %s268_s24 = scalar_lea.sflag (!%p1256_p8), [#allocation6], %s1387_s13 }
  0x66   : > { %s271_s7 = scalar_lea.vmem (!%p1256_p8), [#allocation5], %s745_s16  ;;  %p1520_p7 = scmp.ne.s32.totalorder (!%p1256_p8), %s1514_s28, 0 }
  0x6b   : > { %1118 = dma.done.wait (%p1520_p7), %s268_s24, 64  }
  0x6c   : > { %1120 = vsyncadd (%p1520_p7), %s268_s24, 4294967232  ;;  %p1521_p12 = scmp.ne.s32.totalorder %s1512_s26, 0 }
  0x6e   : > { %1122 = dma.done.wait (%p1521_p12), [#allocation9], 2304  }
  0x6f   : > { %1124 = vsyncadd (%p1521_p12), [#allocation9], 4294964992  ;;  %vm317_vm0 = vcmask 0   ;;  %v1164_v0 = vmov 0.0   ;;  %vm1165_vm1 = vmmov 0   ;;  %v1166_v1 = vmov 0.0|0.0  }
  0x70   : > { %319 = vst.msk [vmem:[#allocation3] sm:$0x1] %vm317_vm0, %v1164_v0  ;;  %320 = vst.msk [vmem:[#allocation4] sm:$0x1] %vm317_vm0, %v1164_v0  ;;  %778 = vmatprep.subr.bf16.mxu0 %v1164_v0  ;;  %782 = vmatprep.mubr.msk.bf16.mxu0 %vm1165_vm1, %v1164_v0  ;;  %v945_v2 = vld [vmem:[#allocation8] sm:$0xff]   ;;  %v946_v3 = vld [vmem:[#allocation8 + $0x8] sm:$0xff]   ;;  %v490_v42 = vlaneseq }
  0x71   : > { %821 = vmatprep.subr.bf16.mxu1 %v1166_v1  ;;  %818 = vmatprep.mubr.msk.f32.mxu1 %vm1165_vm1, %v1164_v0  ;;  %v390_v4 = vld [vmem:[#allocation10] sm:$0xff]  ;;  %v391_v5 = vld [vmem:[#allocation10 + $0x8] sm:$0xff]  ;;  %v392_v7 = vld [vmem:[#allocation10 + $0x10] sm:$0xff]  ;;  %vm345_vm2 = vcmask 261120   ;;  %v1167_v29 = vmov -inf   ;;  %s748_s26 = sshll.u32 %s1387_s13, 3 }
  0x72   : > { %779 = vmatpush3.bf16.msra.mxu0 %v945_v2  ;;  %v822_v6 = vpack.c.bf16 %v391_v5, %v390_v4  ;;  %v393_v8 = vld [vmem:[#allocation10 + $0x18] sm:$0xff]  ;;  %v321_v10 = vld [vmem:[%s271_s7] sm:$0xf]  ;;  %v394_v11 = vld [vmem:[#allocation10 + $0x20] sm:$0xff]  ;;  %318 = vst.msk [vmem:[#allocation2] sm:$0x1] %vm317_vm0, %v1167_v29 }
  0x73   : > { %780 = vmatprep.subr.bf16.mxu0 %v1164_v0  ;;  %v825_v9 = vpack.c.bf16 %v393_v8, %v392_v7  ;;  %v395_v12 = vld [vmem:[#allocation10 + $0x28] sm:$0xff]  ;;  %v396_v14 = vld [vmem:[#allocation10 + $0x30] sm:$0xff]  ;;  %v397_v15 = vld [vmem:[#allocation10 + $0x38] sm:$0xff]  ;;  %s1406_s25 = scalar_lea.vmem [#allocation11], %s748_s26  ;;  %v1168_v36 = vmov 0   ;;  %vm477_vm3 = vcmask 7168  }
  0x74   : > { %823 = vmatpush3.bf16.msra.mxu1 %v822_v6  ;;  %v828_v13 = vpack.c.bf16 %v395_v12, %v394_v11  ;;  %v831_v16 = vpack.c.bf16 %v397_v15, %v396_v14  ;;  %v398_v17 = vld [vmem:[#allocation10 + $0x40] sm:$0xff]  ;;  %v399_v18 = vld [vmem:[#allocation10 + $0x48] sm:$0xff]  ;;  %v400_v20 = vld [vmem:[#allocation10 + $0x50] sm:$0xff]  ;;  %944 = vset.pattern.permute.xlu1 %v1168_v36  ;;  %s1169_s6 = smov 127   ;;  %v491_v45 = vshrl.u32 %v490_v42, 7  ;;  %s754_s9 = sshll.u32 %s1147_s21, 7 }
  0x75   : > { %824 = vmatprep.subr.bf16.mxu1 %v1166_v1  ;;  %v834_v19 = vpack.c.bf16 %v399_v18, %v398_v17  ;;  %v401_v21 = vld [vmem:[#allocation10 + $0x58] sm:$0xff]  ;;  %v402_v23 = vld [vmem:[#allocation10 + $0x60] sm:$0xff]  ;;  %v403_v24 = vld [vmem:[#allocation10 + $0x68] sm:$0xff]  ;;  %943 = vset.pattern.permute.xlu0 %v1168_v36  ;;  %s1423_s27 = scalar_lea.hbm %s1506_s4, %s754_s9  ;;  %s589_s8 = sshll.u32 %s1406_s25, 4  ;;  %s590_s8 = int_to_ptr.vmem [resolvable:$true] %s589_s8 }
  0x76   : > { %781 = vmatpush3.bf16.msra.mxu0 %v946_v3  ;;  %v837_v22 = vpack.c.bf16 %v401_v21, %v400_v20  ;;  %v840_v25 = vpack.c.bf16 %v403_v24, %v402_v23  ;;  %v404_v26 = vld [vmem:[#allocation10 + $0x70] sm:$0xff]  ;;  %v405_v27 = vld [vmem:[#allocation10 + $0x78] sm:$0xff]  ;;  %v749_v30 = vld [vmem:[%s1504_s2] ss:$0 sm:$0xff]  ;;  %v1411_v49 = vsub.s32 0, %v491_v45  ;;  %s570_s10 = scalar_lea.sflag [#allocation7], %s1387_s13 }
  0x77   : > { %v843_v28 = vpack.c.bf16 %v405_v27, %v404_v26  ;;  %v498_v63 = vld [vmem:[#allocation3] sm:$0x1]  ;;  %s1037_s16 = scalar_lea.vmem %s590_s8, 128  ;;  %p1522_p2 = scmp.ne.s32.totalorder %s1518_s14, 0 }
  0x78   : > { %826 = vmatpush3.bf16.msra.mxu1 %v825_v9  ;;  %p1038_p8 = scmp.ne.s32.totalorder %s590_s8, %s1037_s16  ;;  %s1170_s24 = smov [#allocation11]  }
  0x79   : > { %783 = vmatmul.mubr.msk.bf16.vlgmr.msra.gmra.mrb[0].mxu0 %vm345_vm2, %v321_v10  ;;  %827 = vmatprep.subr.bf16.mxu1 %v1166_v1  ;;  %v476_v47 = vld [vmem:[#allocation2] sm:$0x1]  ;;  %s1041_s7 = sshll.u32 %s1170_s24, 4  ;;  %s1042_s7 = int_to_ptr.vmem [resolvable:$false] %s1041_s7 }
  0x7a   : > { %p1039_p1 = pnand %p1038_p8, %p1522_p2  ;;  %s1043_s26 = scalar_lea.vmem %s1042_s7, 256 }
  0x7b   : > { %p1044_p3 = scmp.lt.s32.totalorder %s590_s8, %s1042_s7  ;;  %p1045_p5 = scmp.lt.s32.totalorder %s1043_s26, %s1037_s16 }
  0x7c   : > { %829 = vmatpush3.bf16.msra.mxu1 %v828_v13  ;;  %v510_v13 = vld [vmem:[#allocation4] sm:$0x1]  ;;  %p1040_p10 = pneg %p1039_p1 }
  0x7d   : > { %830 = vmatprep.subr.bf16.mxu1 %v1166_v1  ;;  %p1046_p9 = por %p1045_p5, %p1044_p3 }
  0x7f   : > { %p1047_p11 = pnand %p1046_p9, %p1040_p10 }
  0x80   : > { %832 = vmatpush3.bf16.msra.mxu1 %v831_v16 }
  0x81   : > { %833 = vmatprep.subr.bf16.mxu1 %v1166_v1 }
  0x84   : > { %835 = vmatpush3.bf16.msra.mxu1 %v834_v19 }
  0x85   : > { %836 = vmatprep.subr.bf16.mxu1 %v1166_v1 }
  0x88   : > { %838 = vmatpush3.bf16.msra.mxu1 %v837_v22 }
  0x89   : > { %839 = vmatprep.subr.bf16.mxu1 %v1166_v1 }
  0x8c   : > { %841 = vmatpush3.bf16.msra.mxu1 %v840_v25 }
  0x8d   : > { %842 = vmatprep.subr.bf16.mxu1 %v1166_v1 }
  0x90   : > { %844 = vmatpush3.bf16.msra.mxu1 %v843_v28 }
 0x14c   : > { %v383_v31 = vpop.f32.mrb[0].mxu0 }
 0x14d   : > { %v384_v32 = vadd.f32 %v749_v30, %v383_v31  ;;  %v784_v33 = vpop.f32.mrb[1].mxu0 }
 0x14e   : > { %v386_v34 = vpop.f32.mrb[2].mxu0 }
 0x14f   : > { %389 = vst [vmem:[%s1406_s25] sm:$0xff] %v384_v32  ;;  %v785_v35 = vpop.f32.mrb[3].mxu0  ;;  %819 = vmatmul.mubr.f32.vlgmr.msra.gmra.mrb[0].mxu1 %v384_v32 }
 0x222   : > { %v472_v37 = vpop.f32.mrb[0].mxu1 }
 0x223   : > { %v478_v38 = vsel %vm477_vm3, %v472_v37, -inf  ;;  %513 = vrot.lane.b32.xlu0 %v472_v37, %s1169_s6  ;;  %v820_v39 = vpop.f32.mrb[1].mxu1 }
 0x224   : > { %v479_v40 = vrot.slane %v478_v38, 4 }
 0x226   : > { %v480_v41 = vmax.f32 %v478_v38, %v479_v40 }
 0x228   : > { %v481_v43 = vrot.slane %v480_v41, 2 }
 0x22a   : > { %v482_v44 = vmax.f32 %v480_v41, %v481_v43 }
 0x22c   : > { %v483_v46 = vrot.slane %v482_v44, 1 }
 0x22e   : > { %v484_v48 = vmax.f32 %v482_v44, %v483_v46 }
 0x230   : > { %v485_v50 = vmax.f32 %v476_v47, %v484_v48 }
 0x232   : > { %v493_v51 = vrot.slane %v485_v50, %v1411_v49  ;;  %526 = vst.msk [vmem:[#allocation2] sm:$0x1] %vm317_vm0, %v485_v50  ;;  %v486_v54 = vsub.f32 %v476_v47, %v485_v50 }
 0x234   : > { %v495_v52 = vsub.f32 %v472_v37, %v493_v51  ;;  %v487_v55 = vmul.f32 1.442695, %v486_v54 }
 0x236   : > { %v496_v53 = vmul.f32 1.442695, %v495_v52 }
 0x238   : > { %947 = vpow2.f32 %v496_v53 }
 0x239   : > { %949 = vpow2.f32 %v487_v55  ;;  %v533_v5 = vld [vmem:[#allocation2] sm:$0x1] }
 0x242   : > { %v948_v56 = vpop.eup %947 }
 0x243   : > { %v500_v57 = vsel %vm477_vm3, %v948_v56, 0.0  ;;  %v950_v62 = vpop.eup %949 }
 0x244   : > { %v501_v58 = vrot.slane %v500_v57, 4  ;;  %v499_v1 = vmul.f32 %v950_v62, %v498_v63  ;;  %v511_v15 = vmul.f32 %v950_v62, %v510_v13 }
 0x246   : > { %v502_v59 = vadd.f32 %v501_v58, %v500_v57 }
 0x248   : > { %v503_v60 = vrot.slane %v502_v59, 2 }
 0x24a   : > { %v504_v61 = vadd.f32 %v503_v60, %v502_v59 }
 0x24c   : > { %v505_v0 = vrot.slane %v504_v61, 1 }
 0x24e   : > { %v506_v2 = vadd.f32 %v505_v0, %v504_v61 }
 0x250   : > { %v507_v3 = vadd.f32 %v506_v2, %v499_v1 }
 0x252   : > { %509 = vst.msk [vmem:[#allocation3] sm:$0x1] %vm317_vm0, %v507_v3 }
 0x259   : > { %v544_v4 = vld [vmem:[#allocation3] sm:$0x1] }
 0x25a   : > { %547 = vperm.xlu1 %944, %v544_v4  }
 0x25e   : > { %536 = vperm.xlu1 %944, %v533_v5  }
 0x295   : > { %v514_v6 = vpop.permute.xlu0 %513 }
 0x296   : > { %v516_v7 = vmul.f32 %v948_v56, %v514_v6 }
 0x298   : > { %v517_v8 = vsel %vm477_vm3, %v516_v7, 0.0 }
 0x299   : > { %v518_v9 = vrot.slane %v517_v8, 4 }
 0x29b   : > { %v519_v10 = vadd.f32 %v518_v9, %v517_v8 }
 0x29d   : > { %v520_v11 = vrot.slane %v519_v10, 2 }
 0x29f   : > { %v521_v12 = vadd.f32 %v520_v11, %v519_v10 }
 0x2a1   : > { %v522_v14 = vrot.slane %v521_v12, 1 }
 0x2a3   : > { %v523_v16 = vadd.f32 %v522_v14, %v521_v12 }
 0x2a5   : > { %v524_v17 = vadd.f32 %v523_v16, %v511_v15 }
 0x2a7   : > { %525 = vst.msk [vmem:[#allocation4] sm:$0x1] %vm317_vm0, %v524_v17 }
 0x2ae   : > { %v555_v18 = vld [vmem:[#allocation4] sm:$0x1] }
 0x2af   : > { %558 = vperm.xlu0 %943, %v555_v18  }
 0x2b0   : > { %1050 = shalt.err (!%p1047_p11)
}
 0x2b1   : > { %s1051_s28 = scalar_lea.hbm %s1423_s27, 128  ;;  %s1055_s6 = scalar_lea.hbm %s1506_s4, 256 }
 0x2b2   : > { %p1052_p0 = scmp.ne.s32.totalorder %s1423_s27, %s1051_s28  ;;  %p1056_p6 = scmp.lt.u32.totalorder %s1423_s27, %s1506_s4 }
 0x2b3   : > { %p1057_p7 = scmp.lt.u32.totalorder %s1055_s6, %s1051_s28  ;;  %p1059_p8 = scmp.lt.u32.totalorder %s1051_s28, %s1423_s27 }
 0x2b4   : > { %p1053_p4 = pnand %p1052_p0, %p1522_p2 }
 0x2b5   : > { %p1058_p12 = por %p1057_p7, %p1056_p6 }
 0x2b6   : > { %p1054_p13 = pneg %p1053_p4 }
 0x2b7   : > { %p1060_p1 = por %p1059_p8, %p1058_p12 }
 0x2b9   : > { %p1061_p10 = pnand %p1060_p1, %p1054_p13 }
 0x2bb   : > { %1064 = shalt.err (!%p1061_p10)
}
 0x2bc   : > { %855 = dma.vmem_to_hbm [thread:$0]  (%p1522_p2), %s590_s8, 128, %s1423_s27, %s570_s10   ;;  %v531_v20 = vand.u32 127, %v490_v42 }
 0x2bd   : > { %s755_s15 = sshll.u32 %s1147_s21, 4  ;;  %s309_s16 = scalar_lea.vmem [#allocation12], %s1387_s13 }
 0x2be   : > { %vm554_vm4 = vcmp.eq.s32.totalorder %v531_v20, 2  ;;  %vm543_vm5 = vcmp.eq.s32.totalorder %v531_v20, 1  ;;  %s603_s24 = sshll.u32 %s309_s16, 4  ;;  %vm532_vm6 = vcmp.eq.s32.totalorder %v531_v20, 0  ;;  %s1453_s10 = scalar_lea.hbm %s1507_s5, %s755_s15  ;;  %s1455_s24 = int_to_ptr.vmem [resolvable:$true] %s603_s24 }
 0x2bf   : > { %s575_s21 = scalar_lea.sflag [#allocation13], %s1387_s13  ;;  %s1065_s7 = scalar_lea.vmem %s1455_s24, 16 }
 0x2c0   : > { %p1066_p3 = scmp.ne.s32.totalorder %s1455_s24, %s1065_s7  ;;  %s1171_s26 = smov [#allocation12]  }
 0x2c1   : > { %s1069_s28 = sshll.u32 %s1171_s26, 4  ;;  %s1070_s28 = int_to_ptr.vmem [resolvable:$false] %s1069_s28 }
 0x2c2   : > { %p1067_p5 = pnand %p1066_p3, %p1522_p2  ;;  %s1071_s30 = scalar_lea.vmem %s1070_s28, 32 }
 0x2c3   : > { %p1072_p11 = scmp.lt.s32.totalorder %s1455_s24, %s1070_s28  ;;  %p1073_p0 = scmp.lt.s32.totalorder %s1071_s30, %s1065_s7 }
 0x2c4   : > { %p1068_p9 = pneg %p1067_p5 }
 0x2c5   : > { %p1074_p4 = por %p1073_p0, %p1072_p11 }
 0x2c7   : > { %p1075_p13 = pnand %p1074_p4, %p1068_p9 }
 0x2d9   : > { %v548_v19 = vpop.permute.xlu1 %547 }
 0x2da   : > { %v553_v24 = vrot.slane %v548_v19, %v1411_v49 }
 0x2dd   : > { %v537_v21 = vpop.permute.xlu1 %536 }
 0x2de   : > { %v542_v25 = vrot.slane %v537_v21, %v1411_v49 }
 0x32e   : > { %v559_v22 = vpop.permute.xlu0 %558 }
 0x32f   : > { %v564_v23 = vrot.slane %v559_v22, %v1411_v49 }
 0x331   : > { %v565_v26 = vsel %vm554_vm4, %v564_v23, 0.0 }
 0x332   : > { %v566_v27 = vsel %vm543_vm5, %v553_v24, %v565_v26 }
 0x333   : > { %v567_v28 = vsel %vm532_vm6, %v542_v25, %v566_v27 }
 0x334   : > { %568 = vst [vmem:[%s309_s16] sm:$0x1] %v567_v28 }
 0x335   : > { %1078 = shalt.err (!%p1075_p13)
}
 0x336   : > { %s1079_s13 = scalar_lea.hbm %s1453_s10, 16  ;;  %s1083_s9 = scalar_lea.hbm %s1507_s5, 32 }
 0x337   : > { %p1080_p6 = scmp.ne.s32.totalorder %s1453_s10, %s1079_s13  ;;  %p1084_p8 = scmp.lt.u32.totalorder %s1453_s10, %s1507_s5 }
 0x338   : > { %p1085_p1 = scmp.lt.u32.totalorder %s1083_s9, %s1079_s13  ;;  %p1087_p3 = scmp.lt.u32.totalorder %s1079_s13, %s1453_s10 }
 0x339   : > { %p1081_p7 = pnand %p1080_p6, %p1522_p2 }
 0x33a   : > { %p1086_p10 = por %p1085_p1, %p1084_p8 }
 0x33b   : > { %p1082_p12 = pneg %p1081_p7 }
 0x33c   : > { %p1088_p5 = por %p1087_p3, %p1086_p10 }
 0x33e   : > { %p1089_p9 = pnand %p1088_p5, %p1082_p12 }
 0x340   : > { %1092 = shalt.err (!%p1089_p9)
}
 0x341   : > { %856 = dma.vmem_to_hbm [thread:$0]  (%p1522_p2), %s1455_s24, 16, %s1453_s10, %s575_s21  }
 0x342 PF: > { %s615_s16 = sand.u32 1, %s1135_s18   ;;  %p1523_p11 = scmp.ne.s32.totalorder %s1515_s29, 0 }
 0x343   : > { %p1524_p0 = scmp.ge.s32.totalorder %s1155_s23, 2  ;;  %s616_s27 = scalar_lea.sflag [#allocation7], %s615_s16 }
 0x345   : > { %p871_p4 = pnand %p1524_p0, %p1523_p11 }
 0x347   : > { %1126 = dma.done.wait (!%p871_p4), %s616_s27, 128  }
 0x348   : > { %1128 = vsyncadd (!%p871_p4), %s616_s27, 4294967168  ;;  %s625_s8 = scalar_lea.sflag [#allocation13], %s615_s16 }
 0x349   : > { %1130 = dma.done.wait (!%p871_p4), %s625_s8, 16  }
 0x34a   : > { %1132 = vsyncadd (!%p871_p4), %s625_s8, 4294967280  ;;  %s26_s23 = sadd.s32 1, %s1155_s23   ;;  %s1525_s18 = smov %s1139_s19 }
 0x34b   : > { %p23_p13 = scmp.ge.s32.totalorder %s26_s23, 4   ;;  %s1526_s19 = smov %s1143_s20 }
 0x34c   : > { %s1527_s20 = smov %s1344_s17  ;;  %s1528_s21 = smov %s1151_s22 }
 0x34d   : > { %s1529_s22 = smov %s1531_s12  ;;  %25 = sbr.rel (!%p23_p13) target bundleno = 9 (0x9), region = 114 }
 0x354   :  { %629 = vsyncpa [#allocation6], 1 }
 0x355   :  { %631 = vsyncpa [#allocation6 + $0x1], 1 }
 0x356   :  { %632 = vsyncpa [#allocation9], 1 }
 0x357   :  { %633 = vsyncpa [#allocation7], 1 }
 0x358   :  { %635 = vsyncpa [#allocation7 + $0x1], 1 }
 0x359   :  { %636 = vsyncpa [#allocation13], 1 }
 0x35a   :  { %638 = vsyncpa [#allocation13 + $0x1], 1 }

</bundles_post_ra>
